<compile_context>
chip_gen: v7x
topology: tpu7x:2x2x1
jax: 0.10.0
libtpu: 0.0.40
codegen_flags: <defaults>
</compile_context>

<pallas_src>
import jax
import jax.numpy as jnp
from jax.experimental import pallas as pl
from jax.experimental.pallas import tpu as pltpu


def _normalize_kernel(x_ref, mean_ref, inv_ref, o_ref):
    # x_ref / o_ref: (R, L) VMEM tiles. mean_ref / inv_ref: (R, 1) fp32 tiles
    # holding the per-row (= per (n, c)) channel stats; they broadcast across
    # the lane axis in-register, so the body is one fused subtract-multiply.
    x = x_ref[...].astype(jnp.float32)
    o_ref[...] = ((x - mean_ref[...]) * inv_ref[...]).astype(o_ref.dtype)


def _sublane_align(dtype):
    # Min sublane tile: 8 for 32-bit, 16 for 16-bit, 32 for 8-bit dtypes.
    return max(8, 32 // jnp.dtype(dtype).itemsize)


def _pick_block(dim, target, align):
    """Largest legal block <= target for a dimension of size `dim`.

    Preference: (1) full extent (always legal), (2) a multiple of `align` that
    divides `dim` exactly (no masked edge blocks / wasted DMA), (3) the largest
    multiple of `align` <= target (edge blocks masked).
    """
    if dim <= target:
        return dim
    cap = max(align, (target // align) * align)
    for cand in range(cap, max(align, cap // 2) - 1, -align):
        if dim % cand == 0:
            return cand
    return cap


def normalize_by_channel_mean_std(x, mean, std, *, row_tile=256, lane_tile=2048,
                                  force_pallas=False):
    """Pallas equivalent of NormalizeByChannelMeanStd.forward for NCHW input."""
    N, C, H, W = x.shape
    rows, lanes = N * C, H * W
    itemsize = jnp.dtype(x.dtype).itemsize

    # Per-channel stats, fp32, with the divide replaced by a reciprocal multiply.
    mean_f = jnp.asarray(mean, jnp.float32).reshape(C)
    inv_f = 1.0 / jnp.asarray(std, jnp.float32).reshape(C)

    # Tiny-input guard: a (near) single-step grid runs on one TensorCore and the
    # fixed pallas_call / DMA setup overhead dominates -> plain XLA is faster.
    if not force_pallas and rows * lanes * itemsize < (1 << 20):
        y = (x.astype(jnp.float32) - mean_f[None, :, None, None]) * inv_f[None, :, None, None]
        return y.astype(x.dtype)

    # Lane-dense 2-D view; per-row (= per (n, c)) stat columns.
    x2 = x.reshape(rows, lanes)
    mean_rows = jnp.tile(mean_f, (N,)).reshape(rows, 1)
    inv_rows = jnp.tile(inv_f, (N,)).reshape(rows, 1)

    # Explicit, generation-aware VMEM budget (v7x has only 64 MiB physical).
    try:
        phys_vmem = pltpu.get_tpu_info().vmem_capacity_bytes
    except Exception:
        phys_vmem = 64 << 20  # conservative: assume v7x
    vmem_limit = int(min(phys_vmem // 2, 32 << 20))

    row_align = _sublane_align(x.dtype)
    R = _pick_block(rows, max(row_tile, row_align), row_align)
    L = _pick_block(lanes, max(lane_tile, 128), 128)

    def _footprint(r, l):
        tile = r * l * itemsize            # x tile; out tile has same dtype/size
        stats = 2 * r * 128 * 4            # two (R,1) f32 blocks, lane-padded
        return 2 * (tile + tile) + 2 * stats   # double-buffered in/out + stats

    # Shrink the lane tile if the double-buffered footprint would overshoot.
    while _footprint(R, L) > vmem_limit and L > 128:
        L = max(128, ((L // 2) // 128) * 128)
    assert _footprint(R, L) <= vmem_limit, "tile footprint exceeds VMEM budget"

    # v7x has 2 TensorCores: avoid an odd (e.g. 3-vs-1) split on the only
    # multi-block parallel axis, which would strand ~a third of one core.
    if pl.cdiv(lanes, L) == 1 and pl.cdiv(rows, R) > 1 and pl.cdiv(rows, R) % 2 == 1:
        half = ((R // 2) // row_align) * row_align
        if half >= row_align:
            R = half

    grid = (pl.cdiv(rows, R), pl.cdiv(lanes, L))

    out2 = pl.pallas_call(
        _normalize_kernel,
        out_shape=jax.ShapeDtypeStruct((rows, lanes), x.dtype),
        grid=grid,
        in_specs=[
            pl.BlockSpec((R, L), lambda i, j: (i, j)),   # x tile
            pl.BlockSpec((R, 1), lambda i, j: (i, 0)),   # per-row mean
            pl.BlockSpec((R, 1), lambda i, j: (i, 0)),   # per-row 1/std
        ],
        out_specs=pl.BlockSpec((R, L), lambda i, j: (i, j)),
        compiler_params=pltpu.CompilerParams(
            dimension_semantics=("parallel", "parallel"),
            vmem_limit_bytes=vmem_limit,
        ),
    )(x2, mean_rows, inv_rows)

    return out2.reshape(N, C, H, W)


if __name__ == "__main__":
    key = jax.random.PRNGKey(0)
    N, C, H, W = 2, 4, 16, 16

    x = jax.random.normal(key, (N, C, H, W), dtype=jnp.float32)
    # Deterministic per-channel "buffers" (module __init__ takes mean/std of shape (C,)).
    mean = jnp.array([0.485, 0.456, 0.406, 0.5], dtype=jnp.float32)
    std = jnp.array([0.229, 0.224, 0.225, 0.25], dtype=jnp.float32)

    # force_pallas=True so the demo-sized input exercises the kernel path
    # (production callers can leave it False to get the tiny-input XLA fallback).
    out = normalize_by_channel_mean_std(x, mean, std, force_pallas=True)
    out = jax.block_until_ready(out)

    # Reference check (plain JAX broadcast, mirrors the PyTorch semantics).
    ref = (x - mean[None, :, None, None]) / std[None, :, None, None]
    assert out.shape == x.shape and out.dtype == x.dtype
    assert jnp.allclose(out, ref, atol=1e-5, rtol=1e-6)

    print("KERNEL_OK")
</pallas_src>

<mosaic_0001>
module attributes {stable_mosaic.version = 11 : i64} {
  func.func @_normalize_kernel(%arg0: i32, %arg1: i32, %arg2: memref<8x256xf32, #tpu.memory_space<vmem>>, %arg3: memref<8x1xf32, #tpu.memory_space<vmem>>, %arg4: memref<8x1xf32, #tpu.memory_space<vmem>>, %arg5: memref<8x256xf32, #tpu.memory_space<vmem>>) attributes {dimension_semantics = [#tpu.dimension_semantics<parallel>, #tpu.dimension_semantics<parallel>], iteration_bounds = array<i64: 1, 1>, scalar_prefetch = 0 : i64, scratch_operands = 0 : i64, tpu.core_type = #tpu.core_type<tc>, window_params = [{transform_indices = @transform_0, window_bounds = array<i64: 8, 256>}, {transform_indices = @transform_1, window_bounds = array<i64: 8, 1>}, {transform_indices = @transform_2, window_bounds = array<i64: 8, 1>}, {transform_indices = @transform_3, window_bounds = array<i64: 8, 256>}]} {
    %c0 = arith.constant 0 : index
    %c0_0 = arith.constant 0 : index
    %0 = vector.load %arg2[%c0, %c0_0] : memref<8x256xf32, #tpu.memory_space<vmem>>, vector<8x256xf32>
    %c0_1 = arith.constant 0 : index
    %c0_2 = arith.constant 0 : index
    %1 = vector.load %arg3[%c0_1, %c0_2] : memref<8x1xf32, #tpu.memory_space<vmem>>, vector<8x1xf32>
    %2 = vector.broadcast %1 : vector<8x1xf32> to vector<8x256xf32>
    %3 = arith.subf %0, %2 : vector<8x256xf32>
    %c0_3 = arith.constant 0 : index
    %c0_4 = arith.constant 0 : index
    %4 = vector.load %arg4[%c0_3, %c0_4] : memref<8x1xf32, #tpu.memory_space<vmem>>, vector<8x1xf32>
    %5 = vector.broadcast %4 : vector<8x1xf32> to vector<8x256xf32>
    %6 = arith.mulf %3, %5 : vector<8x256xf32>
    %c0_5 = arith.constant 0 : index
    %c0_6 = arith.constant 0 : index
    %7 = vector.load %arg5[%c0_5, %c0_6] : memref<8x256xf32, #tpu.memory_space<vmem>>, vector<8x256xf32>
    tpu.vector_store %arg5[%c0_5, %c0_6], %6 {strides = array<i32>} : memref<8x256xf32, #tpu.memory_space<vmem>>, vector<8x256xf32>,
    return
  }
  func.func @transform_0(%arg0: i32, %arg1: i32) -> (i32, i32) {
    %c0_i32 = arith.constant 0 : i32
    return %arg0, %arg1 : i32, i32
  }
  func.func @transform_1(%arg0: i32, %arg1: i32) -> (i32, i32) {
    %c0_i32 = arith.constant 0 : i32
    %c0_i32_0 = arith.constant 0 : i32
    return %arg0, %c0_i32 : i32, i32
  }
  func.func @transform_2(%arg0: i32, %arg1: i32) -> (i32, i32) {
    %c0_i32 = arith.constant 0 : i32
    %c0_i32_0 = arith.constant 0 : i32
    return %arg0, %c0_i32 : i32, i32
  }
  func.func @transform_3(%arg0: i32, %arg1: i32) -> (i32, i32) {
    %c0_i32 = arith.constant 0 : i32
    return %arg0, %arg1 : i32, i32
  }
}

</mosaic_0001>

<bundles_post_ra>
// kernel: tpu_custom_call.1
= control target key start
LH: loop header
LB: loop body
LE: loop exit
PB: predicated region body
PF: predicated region fallthrough
CT: control target
= control target key end

     0   :  { %s122_s0 = inlined_call_operand.vmem [shape: f32[8,256], index: 0, kind: input, shape index: {}]   ;;  %s123_s1 = inlined_call_operand.vmem [shape: f32[8,1], index: 1, kind: input, shape index: {}]   ;;  %s124_s2 = inlined_call_operand.vmem [shape: f32[8,1], index: 2, kind: input, shape index: {}]   ;;  %s125_s3 = inlined_call_operand.hbm [shape: f32[8,256], index: 3, kind: output, shape index: {}]  }
   0x1   :  { %v17_v0 = vld [vmem:[%s123_s1] sm:$0xff] }
   0x2   :  { %8 = vsyncpa [#allocation3], 0  ;;  %v76_v1 = vmov 0   ;;  %v25_v2 = vld [vmem:[%s124_s2] sm:$0xff]  ;;  %v16_v5 = vld [vmem:[%s122_s0 + $0x8] sm:$0xff]  ;;  %s77_s20 = smov [#allocation2]  }
   0x3   :  { %51 = vset.pattern.permute.xlu0 %v76_v1  ;;  %v15_v4 = vld [vmem:[%s122_s0] sm:$0xff]  ;;  %s41_s1 = sshll.u32 %s77_s20, 4  ;;  %s42_s1 = int_to_ptr.vmem [resolvable:$true] %s41_s1 }
   0x4   :  { %20 = vperm.xlu0 %51, %v17_v0   ;;  %s52_s2 = scalar_lea.vmem %s42_s1, 256  ;;  %p57_p1 = scmp.lt.s32.totalorder %s42_s1, %s42_s1 }
   0x5   :  { %p53_p0 = scmp.ne.s32.totalorder %s42_s1, %s52_s2  ;;  %p58_p2 = scmp.lt.s32.totalorder %s52_s2, %s52_s2 }
   0x7   :  { %p59_p3 = por %p58_p2, %p57_p1 }
   0x8   :  { %28 = vperm.xlu0 %51, %v25_v2  }
   0x9   :  { %p60_p4 = pnand %p59_p3, %p53_p0 }
  0x83   :  { %v21_v3 = vpop.permute.xlu0 %20 }
  0x84   :  { %v23_v6 = vsub.f32 %v15_v4, %v21_v3  ;;  %v24_v7 = vsub.f32 %v16_v5, %v21_v3 }
  0x87   :  { %v29_v8 = vpop.permute.xlu0 %28 }
  0x88   :  { %v31_v9 = vmul.f32 %v29_v8, %v23_v6  ;;  %v32_v10 = vmul.f32 %v29_v8, %v24_v7 }
  0x8a   :  { %33 = vst [vmem:[#allocation2] sm:$0xff] %v31_v9  ;;  %34 = vst [vmem:[#allocation2 + $0x8] sm:$0xff] %v32_v10 }
  0x8b   :  { %63 = shalt.err (!%p60_p4)
}
  0x8c   :  { %s64_s0 = scalar_lea.hbm %s125_s3, 256 }
  0x8d   :  { %p65_p5 = scmp.ne.s32.totalorder %s125_s3, %s64_s0  ;;  %p68_p6 = scmp.lt.u32.totalorder %s64_s0, %s125_s3 }
  0x8f   :  { %p70_p7 = pnand %p68_p6, %p65_p5 }
  0x91   :  { %73 = shalt.err (!%p70_p7)
}
  0x92   :  { %44 = dma.vmem_to_hbm [thread:$0]  %s42_s1, 256, %s125_s3, [#allocation3]  }
  0x93   :  { %74 = dma.done.wait [#allocation3], 256  }
  0x94   :  { %75 = vsyncadd [#allocation3], 4294967040 }
  0x95   :  { %48 = vsyncpa [#allocation3], 1 }

</bundles_post_ra>
